<compile_context>
chip_gen: v6e
topology: v6e:2x2x1
jax: 0.10.0
libtpu: 0.0.40
codegen_flags: <defaults>
</compile_context>

<pallas_src>
import functools

import jax
import jax.numpy as jnp
from jax import lax
from jax.experimental import pallas as pl
from jax.experimental.pallas import tpu as pltpu


def _make_kernel(HW, Cout, D):
    """Per-batch-element kernel body (D, shapes are static)."""

    def kernel(p_ref, w_ref, wf_ref, b_ref, out_ref):
        # p_ref  : (1, D, 9*Cin, HW) bf16  im2col patches, one batch element
        # w_ref  : (D, Cout, 9*Cin)  bf16  3x3 dilated conv weights (taps fused on K)
        # wf_ref : (D, Cout, Cout)   bf16  1x1 "final" conv weight (transposed), per dilation
        # b_ref  : (Cout, 1)         f32   1x1 conv bias (column vector)
        # out_ref: (1, Cout, HW)     f32   lane-dense output (HW on lanes)
        acc = jnp.zeros((Cout, HW), jnp.float32)
        for di in range(D):  # D is tiny (e.g. 3) -> unrolled at trace time
            # Dilated 3x3 conv == single K=9*Cin GEMM on the MXU, f32 accumulation.
            feat = jnp.dot(w_ref[di], p_ref[0, di],
                           preferred_element_type=jnp.float32)        # (Cout, HW)
            feat = jnp.maximum(feat, 0.0)                              # ReLU in f32
            # 1x1 conv over the concat axis == sum over dilations of Wf_d^T @ feat_d.
            acc = acc + jnp.dot(wf_ref[di], feat.astype(jnp.bfloat16),
                                preferred_element_type=jnp.float32)    # (Cout, HW)
        out_ref[0] = acc + b_ref[...]                                  # bias bcast over HW

    return kernel


def multi_dilation_conv2d(x_nchw, w_dil, w_final, b_final, dilations):
    """x_nchw: (N, Cin, H, W) float32.  Returns (N, Cout, H, W) float32."""
    N, Cin, H, W = x_nchw.shape
    D, KH, KW, _, Cout = w_dil.shape
    assert (KH, KW) == (3, 3) and D == len(dilations)
    pad = max(dilations) * (3 // 2)
    HW, K9 = H * W, 9 * Cin

    # ---- wrapper-side layout plumbing (plain JAX glue) -----------------------
    # NCHW -> NHWC, zero-pad by max dilation, then im2col per dilation into a
    # lane-dense (9*Cin, H*W) slab; cast MXU operands to bf16.
    x_nhwc = jnp.transpose(x_nchw, (0, 2, 3, 1))
    x_pad = jnp.pad(x_nhwc, ((0, 0), (pad, pad), (pad, pad), (0, 0)))
    pats = []
    for d in dilations:
        taps = [x_pad[:, pad + (ky - 1) * d: pad + (ky - 1) * d + H,
                         pad + (kx - 1) * d: pad + (kx - 1) * d + W, :]
                for ky in range(3) for kx in range(3)]
        p = jnp.stack(taps, axis=-2).reshape(N, HW, K9)      # (ky,kx)-major, cin-minor
        pats.append(jnp.transpose(p, (0, 2, 1)))             # (N, 9*Cin, HW)
    patches = jnp.stack(pats, axis=1).astype(jnp.bfloat16)   # (N, D, 9*Cin, HW)

    # Weights: (D,3,3,Cin,Cout) -> (D, Cout, 9*Cin); 1x1: (D,Cout,Cout) -> transposed.
    w_mat = jnp.transpose(w_dil.reshape(D, K9, Cout), (0, 2, 1)).astype(jnp.bfloat16)
    wf_t = jnp.transpose(w_final, (0, 2, 1)).astype(jnp.bfloat16)
    b_col = b_final.reshape(Cout, 1).astype(jnp.float32)

    kernel = _make_kernel(HW, Cout, D)

    out_flat = pl.pallas_call(
        kernel,
        out_shape=jax.ShapeDtypeStruct((N, Cout, HW), jnp.float32),
        grid_spec=pltpu.PrefetchScalarGridSpec(
            num_scalar_prefetch=0,
            grid=(N,),
            in_specs=[
                pl.BlockSpec((1, D, K9, HW), lambda n: (n, 0, 0, 0)),
                pl.BlockSpec((D, Cout, K9), lambda n: (0, 0, 0)),
                pl.BlockSpec((D, Cout, Cout), lambda n: (0, 0, 0)),
                pl.BlockSpec((Cout, 1), lambda n: (0, 0)),
            ],
            out_specs=pl.BlockSpec((1, Cout, HW), lambda n: (n, 0, 0)),
        ),
        compiler_params=pltpu.CompilerParams(dimension_semantics=("parallel",)),
    )(patches, w_mat, wf_t, b_col)

    # (N, Cout, H*W) -> (N, Cout, H, W): same memory layout, free reshape, no transpose.
    return out_flat.reshape(N, Cout, H, W)


def _reference(x_nchw, w_dil, w_final, b_final, dilations):
    """Pure-JAX f32 reference mirroring the PyTorch forward."""
    feats = []
    for di, d in enumerate(dilations):
        w_oihw = jnp.transpose(w_dil[di], (3, 2, 0, 1))  # (Cout, Cin, KH, KW)
        y = lax.conv_general_dilated(
            x_nchw, w_oihw, window_strides=(1, 1),
            padding=[(d, d), (d, d)], rhs_dilation=(d, d),
            dimension_numbers=("NCHW", "OIHW", "NCHW"))
        feats.append(jnp.maximum(y, 0.0))
    cat = jnp.concatenate(feats, axis=1)                      # (N, D*Cout, H, W)
    wf_flat = w_final.reshape(-1, w_final.shape[-1])          # (D*Cout, Cout)
    out = jnp.einsum("nchw,cd->ndhw", cat, wf_flat) + b_final.reshape(1, -1, 1, 1)
    return out


if __name__ == "__main__":
    N, Cin, Cout, H, W = 2, 4, 8, 16, 16
    dilations = (1, 2, 3)
    D = len(dilations)

    key = jax.random.PRNGKey(0)
    kx, kw, kwf, kb = jax.random.split(key, 4)
    x = jax.random.normal(kx, (N, Cin, H, W), dtype=jnp.float32)
    # Deterministic synthetic parameters (shapes from the module __init__).
    w_dil = jax.random.normal(kw, (D, 3, 3, Cin, Cout), dtype=jnp.float32) * 0.1
    w_final = jax.random.normal(kwf, (D, Cout, Cout), dtype=jnp.float32) * 0.1
    b_final = jax.random.normal(kb, (1, Cout), dtype=jnp.float32) * 0.1

    out = jax.block_until_ready(
        jax.jit(functools.partial(multi_dilation_conv2d, dilations=dilations))(
            x, w_dil, w_final, b_final))

    ref = _reference(x, w_dil, w_final, b_final, dilations)
    assert out.shape == (N, Cout, H, W)
    # bf16 MXU operands -> compare against the f32 reference with bf16-level tolerance.
    assert jnp.allclose(out, ref, atol=3e-2, rtol=3e-2), (
        float(jnp.max(jnp.abs(out - ref))))
    print("KERNEL_OK")
</pallas_src>

<mosaic_0001>
module attributes {stable_mosaic.version = 11 : i64} {
  func.func @kernel(%arg0: i32, %arg1: memref<1x3x36x256xbf16, #tpu.memory_space<vmem>>, %arg2: memref<3x8x36xbf16, #tpu.memory_space<vmem>>, %arg3: memref<3x8x8xbf16, #tpu.memory_space<vmem>>, %arg4: memref<8x1xf32, #tpu.memory_space<vmem>>, %arg5: memref<1x8x256xf32, #tpu.memory_space<vmem>>) attributes {dimension_semantics = [#tpu.dimension_semantics<parallel>], iteration_bounds = array<i64: 2>, scalar_prefetch = 0 : i64, scratch_operands = 0 : i64, tpu.core_type = #tpu.core_type<tc>, window_params = [{transform_indices = @transform_0, window_bounds = array<i64: 1, 3, 36, 256>}, {pipeline_mode = #tpu.pipeline_mode<synchronous>, transform_indices = @transform_1, window_bounds = array<i64: 3, 8, 36>}, {pipeline_mode = #tpu.pipeline_mode<synchronous>, transform_indices = @transform_2, window_bounds = array<i64: 3, 8, 8>}, {pipeline_mode = #tpu.pipeline_mode<synchronous>, transform_indices = @transform_3, window_bounds = array<i64: 8, 1>}, {transform_indices = @transform_4, window_bounds = array<i64: 1, 8, 256>}]} {
    %cst = arith.constant 0.000000e+00 : f32
    %0 = vector.broadcast %cst : f32 to vector<8x256xf32>
    %c0 = arith.constant 0 : index
    %c0_0 = arith.constant 0 : index
    %c0_1 = arith.constant 0 : index
    %1 = vector.load %arg2[%c0, %c0_0, %c0_1] : memref<3x8x36xbf16, #tpu.memory_space<vmem>>, vector<1x8x36xbf16>
    %2 = vector.shape_cast %1 : vector<1x8x36xbf16> to vector<8x36xbf16>
    %c0_2 = arith.constant 0 : index
    %c0_3 = arith.constant 0 : index
    %c0_4 = arith.constant 0 : index
    %c0_5 = arith.constant 0 : index
    %3 = vector.load %arg1[%c0_2, %c0_3, %c0_4, %c0_5] : memref<1x3x36x256xbf16, #tpu.memory_space<vmem>>, vector<1x1x36x256xbf16>
    %4 = vector.shape_cast %3 : vector<1x1x36x256xbf16> to vector<36x256xbf16>
    %cst_6 = arith.constant dense<0.000000e+00> : vector<8x256xf32>
    %5 = tpu.matmul %2, %4, %cst_6 {dimension_numbers = #tpu.dot_dimension_numbers<[1], [0], [0], [1], [0, 0, 1, 1], [], []>} : vector<8x36xbf16>, vector<36x256xbf16>, vector<8x256xf32> -> vector<8x256xf32>
    %cst_7 = arith.constant 0.000000e+00 : f32
    %6 = vector.broadcast %cst_7 : f32 to vector<8x256xf32>
    %7 = arith.maximumf %5, %6 : vector<8x256xf32>
    %c0_8 = arith.constant 0 : index
    %c0_9 = arith.constant 0 : index
    %c0_10 = arith.constant 0 : index
    %8 = vector.load %arg3[%c0_8, %c0_9, %c0_10] : memref<3x8x8xbf16, #tpu.memory_space<vmem>>, vector<1x8x8xbf16>
    %9 = vector.shape_cast %8 : vector<1x8x8xbf16> to vector<8x8xbf16>
    %10 = arith.truncf %7 : vector<8x256xf32> to vector<8x256xbf16>
    %cst_11 = arith.constant dense<0.000000e+00> : vector<8x256xf32>
    %11 = tpu.matmul %9, %10, %cst_11 {dimension_numbers = #tpu.dot_dimension_numbers<[1], [0], [0], [1], [0, 0, 1, 1], [], []>} : vector<8x8xbf16>, vector<8x256xbf16>, vector<8x256xf32> -> vector<8x256xf32>
    %12 = arith.addf %0, %11 : vector<8x256xf32>
    %c1 = arith.constant 1 : index
    %c0_12 = arith.constant 0 : index
    %c0_13 = arith.constant 0 : index
    %13 = vector.load %arg2[%c1, %c0_12, %c0_13] : memref<3x8x36xbf16, #tpu.memory_space<vmem>>, vector<1x8x36xbf16>
    %14 = vector.shape_cast %13 : vector<1x8x36xbf16> to vector<8x36xbf16>
    %c0_14 = arith.constant 0 : index
    %c1_15 = arith.constant 1 : index
    %c0_16 = arith.constant 0 : index
    %c0_17 = arith.constant 0 : index
    %15 = vector.load %arg1[%c0_14, %c1_15, %c0_16, %c0_17] : memref<1x3x36x256xbf16, #tpu.memory_space<vmem>>, vector<1x1x36x256xbf16>
    %16 = vector.shape_cast %15 : vector<1x1x36x256xbf16> to vector<36x256xbf16>
    %cst_18 = arith.constant dense<0.000000e+00> : vector<8x256xf32>
    %17 = tpu.matmul %14, %16, %cst_18 {dimension_numbers = #tpu.dot_dimension_numbers<[1], [0], [0], [1], [0, 0, 1, 1], [], []>} : vector<8x36xbf16>, vector<36x256xbf16>, vector<8x256xf32> -> vector<8x256xf32>
    %cst_19 = arith.constant 0.000000e+00 : f32
    %18 = vector.broadcast %cst_19 : f32 to vector<8x256xf32>
    %19 = arith.maximumf %17, %18 : vector<8x256xf32>
    %c1_20 = arith.constant 1 : index
    %c0_21 = arith.constant 0 : index
    %c0_22 = arith.constant 0 : index
    %20 = vector.load %arg3[%c1_20, %c0_21, %c0_22] : memref<3x8x8xbf16, #tpu.memory_space<vmem>>, vector<1x8x8xbf16>
    %21 = vector.shape_cast %20 : vector<1x8x8xbf16> to vector<8x8xbf16>
    %22 = arith.truncf %19 : vector<8x256xf32> to vector<8x256xbf16>
    %cst_23 = arith.constant dense<0.000000e+00> : vector<8x256xf32>
    %23 = tpu.matmul %21, %22, %cst_23 {dimension_numbers = #tpu.dot_dimension_numbers<[1], [0], [0], [1], [0, 0, 1, 1], [], []>} : vector<8x8xbf16>, vector<8x256xbf16>, vector<8x256xf32> -> vector<8x256xf32>
    %24 = arith.addf %12, %23 : vector<8x256xf32>
    %c2 = arith.constant 2 : index
    %c0_24 = arith.constant 0 : index
    %c0_25 = arith.constant 0 : index
    %25 = vector.load %arg2[%c2, %c0_24, %c0_25] : memref<3x8x36xbf16, #tpu.memory_space<vmem>>, vector<1x8x36xbf16>
    %26 = vector.shape_cast %25 : vector<1x8x36xbf16> to vector<8x36xbf16>
    %c0_26 = arith.constant 0 : index
    %c2_27 = arith.constant 2 : index
    %c0_28 = arith.constant 0 : index
    %c0_29 = arith.constant 0 : index
    %27 = vector.load %arg1[%c0_26, %c2_27, %c0_28, %c0_29] : memref<1x3x36x256xbf16, #tpu.memory_space<vmem>>, vector<1x1x36x256xbf16>
    %28 = vector.shape_cast %27 : vector<1x1x36x256xbf16> to vector<36x256xbf16>
    %cst_30 = arith.constant dense<0.000000e+00> : vector<8x256xf32>
    %29 = tpu.matmul %26, %28, %cst_30 {dimension_numbers = #tpu.dot_dimension_numbers<[1], [0], [0], [1], [0, 0, 1, 1], [], []>} : vector<8x36xbf16>, vector<36x256xbf16>, vector<8x256xf32> -> vector<8x256xf32>
    %cst_31 = arith.constant 0.000000e+00 : f32
    %30 = vector.broadcast %cst_31 : f32 to vector<8x256xf32>
    %31 = arith.maximumf %29, %30 : vector<8x256xf32>
    %c2_32 = arith.constant 2 : index
    %c0_33 = arith.constant 0 : index
    %c0_34 = arith.constant 0 : index
    %32 = vector.load %arg3[%c2_32, %c0_33, %c0_34] : memref<3x8x8xbf16, #tpu.memory_space<vmem>>, vector<1x8x8xbf16>
    %33 = vector.shape_cast %32 : vector<1x8x8xbf16> to vector<8x8xbf16>
    %34 = arith.truncf %31 : vector<8x256xf32> to vector<8x256xbf16>
    %cst_35 = arith.constant dense<0.000000e+00> : vector<8x256xf32>
    %35 = tpu.matmul %33, %34, %cst_35 {dimension_numbers = #tpu.dot_dimension_numbers<[1], [0], [0], [1], [0, 0, 1, 1], [], []>} : vector<8x8xbf16>, vector<8x256xbf16>, vector<8x256xf32> -> vector<8x256xf32>
    %36 = arith.addf %24, %35 : vector<8x256xf32>
    %c0_36 = arith.constant 0 : index
    %c0_37 = arith.constant 0 : index
    %37 = vector.load %arg4[%c0_36, %c0_37] : memref<8x1xf32, #tpu.memory_space<vmem>>, vector<8x1xf32>
    %38 = vector.broadcast %37 : vector<8x1xf32> to vector<8x256xf32>
    %39 = arith.addf %36, %38 : vector<8x256xf32>
    %c0_38 = arith.constant 0 : index
    %c0_39 = arith.constant 0 : index
    %c0_40 = arith.constant 0 : index
    %40 = vector.load %arg5[%c0_38, %c0_39, %c0_40] : memref<1x8x256xf32, #tpu.memory_space<vmem>>, vector<1x8x256xf32>
    %41 = vector.shape_cast %40 : vector<1x8x256xf32> to vector<8x256xf32>
    %42 = vector.shape_cast %39 : vector<8x256xf32> to vector<1x8x256xf32>
    tpu.vector_store %arg5[%c0_38, %c0_39, %c0_40], %42 {strides = array<i32>} : memref<1x8x256xf32, #tpu.memory_space<vmem>>, vector<1x8x256xf32>,
    return
  }
  func.func @transform_0(%arg0: i32) -> (i32, i32, i32, i32) {
    %c0_i32 = arith.constant 0 : i32
    %c0_i32_0 = arith.constant 0 : i32
    %c0_i32_1 = arith.constant 0 : i32
    %c0_i32_2 = arith.constant 0 : i32
    return %arg0, %c0_i32, %c0_i32_0, %c0_i32_1 : i32, i32, i32, i32
  }
  func.func @transform_1(%arg0: i32) -> (i32, i32, i32) {
    %c0_i32 = arith.constant 0 : i32
    %c0_i32_0 = arith.constant 0 : i32
    %c0_i32_1 = arith.constant 0 : i32
    %c0_i32_2 = arith.constant 0 : i32
    return %c0_i32, %c0_i32_0, %c0_i32_1 : i32, i32, i32
  }
  func.func @transform_2(%arg0: i32) -> (i32, i32, i32) {
    %c0_i32 = arith.constant 0 : i32
    %c0_i32_0 = arith.constant 0 : i32
    %c0_i32_1 = arith.constant 0 : i32
    %c0_i32_2 = arith.constant 0 : i32
    return %c0_i32, %c0_i32_0, %c0_i32_1 : i32, i32, i32
  }
  func.func @transform_3(%arg0: i32) -> (i32, i32) {
    %c0_i32 = arith.constant 0 : i32
    %c0_i32_0 = arith.constant 0 : i32
    %c0_i32_1 = arith.constant 0 : i32
    return %c0_i32, %c0_i32_0 : i32, i32
  }
  func.func @transform_4(%arg0: i32) -> (i32, i32, i32) {
    %c0_i32 = arith.constant 0 : i32
    %c0_i32_0 = arith.constant 0 : i32
    %c0_i32_1 = arith.constant 0 : i32
    return %arg0, %c0_i32, %c0_i32_0 : i32, i32, i32
  }
}

</mosaic_0001>

<bundles_post_ra>
// kernel: multi_dilation_conv2d.1
= control target key start
LH: loop header
LB: loop body
LE: loop exit
PB: predicated region body
PF: predicated region fallthrough
CT: control target
= control target key end

     0   :  { %s808_s15 = smov 0   ;;  %s892_s0 = inlined_call_operand.vmem [shape: bf16[2,3,36,256], index: 0, kind: input, shape index: {}]   ;;  %s893_s1 = inlined_call_operand.vmem [shape: bf16[3,8,36], index: 1, kind: input, shape index: {}]   ;;  %s894_s2 = inlined_call_operand.vmem [shape: bf16[3,8,8], index: 2, kind: input, shape index: {}]   ;;  %s895_s3 = inlined_call_operand.vmem [shape: f32[8,1], index: 3, kind: input, shape index: {}]   ;;  %s896_s4 = inlined_call_operand.vmem [shape: f32[2,8,256], index: 4, kind: output, shape index: {}]  }
   0x1 LB: > { %s684_s16 = sadd.s32 4294967295, %s780_s15   ;;  %p688_p0 = scmp.ge.s32.totalorder %s780_s15, 1  ;;  %s780_s15 = sphi %s808_s15, %s14_s15  }
   0x2   : > { %p162_p1 = scmp.lt.s32.totalorder %s780_s15, 3 }
   0x4   : > { %p163_p2 = pnand %p688_p0, %p162_p1 }
   0x5   : > { %p188_p3 = scmp.lt.s32.totalorder (!%p163_p2), %s684_s16, 1 }
   0x6   : > { %166 = sbr.rel (%p163_p2) target bundleno = 648 (0x288), region = 36 }
   0xb   : > { %v782_v0 = vmov 0   ;;  %s898_s16 = smov (!%p188_p3, %s684_s16), 1  ;;  %vm234_vm0 = vcmask 1041408   ;;  %v199_v17 = vld [vmem:[%s893_s1] sm:$0xf]  ;;  %vm230_vm1 = vcmask 293888  }
   0xc   : > { %273 = vmatprep.mubr.bf16.mxu0 %v782_v0  ;;  %361 = vmatprep.mubr.bf16.mxu1 %v782_v0  ;;  %s739_s17 = smul.u32 120, %s898_s16  ;;  %v700_v18 = vld [vmem:[%s893_s1 + $0x4] sm:$0xf]  ;;  %vm380_vm2 = vcmask 1043456   ;;  %vm376_vm3 = vcmask 64512   ;;  %s738_s9 = sshll.u32 %s898_s16, 4 }
   0xd   : > { %749 = vset.pattern.permute.xlu0 %v782_v0  ;;  %v714_v40 = vld [vmem:[%s894_s2 + $0x4] sm:$0xf]  ;;  %v284_v41 = vld [vmem:[%s894_s2] sm:$0xf]  ;;  %v719_v47 = vld [vmem:[%s893_s1 + $0x8] sm:$0xf]  ;;  %s197_s12 = scalar_lea.vmem %s896_s4, %s738_s9 }
   0xe   : > { %s825_s20 = scalar_lea.vmem %s892_s0, %s739_s17  ;;  %v619_v48 = vld [vmem:[%s895_s3] sm:$0xff] }
   0xf   : > { %v204_v1 = vld [vmem:[%s825_s20 + $0x20] sm:$0x33]  ;;  %v705_v2 = vld [vmem:[%s825_s20 + $0x48] sm:$0x33]  ;;  %v754_v7 = vld [vmem:[%s825_s20 + $0x14] ss:$8 sps:$4 sm:$0xff]   ;;  %622 = vperm.xlu0 %749, %v619_v48  }
  0x10   : > { %v697_v3 = vcombine.high %v204_v1, %v204_v1  ;;  %v711_v4 = vcombine.high %v705_v2, %v705_v2  ;;  %v696_v5 = vcombine.low %v204_v1, %v204_v1  ;;  %v710_v6 = vcombine.low %v705_v2, %v705_v2  ;;  %v756_v8 = vld [vmem:[%s825_s20 + $0x3c] ss:$8 sps:$4 sm:$0xff]   ;;  %v758_v11 = vld [vmem:[%s825_s20 + $0x10] ss:$8 sps:$4 sm:$0xff]   ;;  %v762_v14 = vld [vmem:[%s825_s20 + $0x2c] ss:$8 sps:$4 sm:$0xff]  }
  0x11   : > { %v759_v12 = vld [vmem:[%s825_s20 + $0x38] ss:$8 sps:$4 sm:$0xff]   ;;  %v760_v13 = vld [vmem:[%s825_s20 + $0x4] ss:$8 sps:$4 sm:$0xff]   ;;  %v765_v16 = vld [vmem:[%s825_s20 + $0x28] ss:$8 sps:$4 sm:$0xff]  }
  0x12   : > { %698 = vmatprep.subr.msk.bf16.mxu0 %vm234_vm0, %v697_v3  ;;  %712 = vmatprep.subr.msk.bf16.mxu1 %vm234_vm0, %v711_v4  ;;  %v236_v9 = vsel %vm234_vm0, %v696_v5, 0  ;;  %v324_v10 = vsel %vm234_vm0, %v710_v6, 0  ;;  %v764_v15 = vld [vmem:[%s825_s20] ss:$8 sps:$4 sm:$0xff]   ;;  %v724_v23 = vld [vmem:[%s825_s20 + $0x70] sm:$0x33] }
  0x13   : > { %252 = vmatpush1.bf16.msra.mxu0 %v236_v9  ;;  %340 = vmatpush1.bf16.msra.mxu1 %v324_v10  ;;  %v730_v31 = vcombine.high %v724_v23, %v724_v23  ;;  %v729_v36 = vcombine.low %v724_v23, %v724_v23  ;;  %v770_v43 = vld [vmem:[%s825_s20 + $0x64] ss:$8 sps:$4 sm:$0xff]   ;;  %v768_v44 = vld [vmem:[%s825_s20 + $0x60] ss:$8 sps:$4 sm:$0xff]   ;;  %v773_v45 = vld [vmem:[%s825_s20 + $0x54] ss:$8 sps:$4 sm:$0xff]  }
  0x14   : > { %253 = vmatprep.subr.bf16.mxu0 %v754_v7  ;;  %341 = vmatprep.subr.bf16.mxu1 %v756_v8  ;;  %v771_v46 = vld [vmem:[%s825_s20 + $0x50] ss:$8 sps:$4 sm:$0xff]   ;;  %v733_v4 = vld [vmem:[%s894_s2 + $0x8] sm:$0xf] }
  0x15   : > { %v515_v42 = vsel %vm234_vm0, %v729_v36, 0 }
  0x17   : > { %254 = vmatpush1.bf16.msra.mxu0 %v758_v11  ;;  %342 = vmatpush1.bf16.msra.mxu1 %v759_v12 }
  0x18   : > { %255 = vmatprep.subr.bf16.mxu0 %v760_v13  ;;  %343 = vmatprep.subr.bf16.mxu1 %v762_v14 }
  0x1b   : > { %256 = vmatpush1.bf16.msra.mxu0 %v764_v15  ;;  %344 = vmatpush1.bf16.msra.mxu1 %v765_v16 }
  0x1e   : > { %699 = vmatmul.mubr.msk.bf16.vlgmr.msra.gmra.mxu0 %vm230_vm1, %v199_v17  ;;  %713 = vmatmul.mubr.msk.bf16.vlgmr.msra.gmra.mxu1 %vm230_vm1, %v700_v18 }
  0x1f   : > { %419 = vmatprep.mubr.bf16.mxu0 %v782_v0  ;;  %469 = vmatprep.mubr.bf16.mxu1 %v782_v0 }
  0x8a   : > { %v623_v6 = vpop.permute.xlu0 %622 }
  0xde   : > { %v275_v19 = vpop.f32.mrf.mxu0  ;;  %v363_v20 = vpop.f32.mrf.mxu1 }
  0xdf   : > { %v282_v21 = vmax.f32 %v275_v19, 0.0  ;;  %v370_v22 = vmax.f32 %v363_v20, 0.0 }
  0xe0   : > { %v277_v24 = vpop.f32.mrf.mxu0  ;;  %v365_v25 = vpop.f32.mrf.mxu1 }
  0xe1   : > { %v285_v26 = vpack.c.bf16 %v282_v21, %v282_v21  ;;  %v374_v27 = vpack.c.bf16 %v370_v22, %v370_v22  ;;  %v283_v28 = vmax.f32 %v277_v24, 0.0  ;;  %v371_v29 = vmax.f32 %v365_v25, 0.0 }
  0xe2   : > { %v367_v30 = vpop.f32.mrf.mxu1  ;;  %v279_v32 = vpop.f32.mrf.mxu0 }
  0xe3   : > { %v432_v33 = vsel %vm380_vm2, %v285_v26, 0  ;;  %v286_v34 = vpack.c.bf16 %v283_v28, %v283_v28  ;;  %v375_v35 = vpack.c.bf16 %v371_v29, %v371_v29  ;;  %v382_v39 = vsel %vm380_vm2, %v374_v27, 0 }
  0xe4   : > { %v368_v37 = vpop.f32.mrf.mxu1  ;;  %v280_v38 = vpop.f32.mrf.mxu0 }
  0xe5   : > { %715 = vmatprep.subr.msk.bf16.mxu0 %vm380_vm2, %v375_v35  ;;  %717 = vmatprep.subr.msk.bf16.mxu1 %vm380_vm2, %v286_v34 }
  0xe6   : > { %402 = vmatpush1.bf16.msra.mxu0 %v382_v39  ;;  %452 = vmatpush1.bf16.msra.mxu1 %v432_v33 }
  0xe7   : > { %731 = vmatprep.subr.msk.bf16.mxu0 %vm234_vm0, %v730_v31 }
  0xe9   : > { %716 = vmatmul.mubr.msk.bf16.vlgmr.msra.gmra.mxu0 %vm376_vm3, %v714_v40  ;;  %718 = vmatmul.mubr.msk.bf16.vlgmr.msra.gmra.mxu1 %vm376_vm3, %v284_v41 }
  0xea   : > { %531 = vmatpush1.bf16.msra.mxu0 %v515_v42  ;;  %552 = vmatprep.mubr.bf16.mxu0 %v782_v0 }
  0xeb   : > { %532 = vmatprep.subr.bf16.mxu0 %v770_v43  ;;  %608 = vmatprep.mubr.bf16.mxu1 %v782_v0 }
  0xee   : > { %533 = vmatpush1.bf16.msra.mxu0 %v768_v44 }
  0xef   : > { %534 = vmatprep.subr.bf16.mxu0 %v773_v45 }
  0xf2   : > { %535 = vmatpush1.bf16.msra.mxu0 %v771_v46 }
  0xf5   : > { %732 = vmatmul.mubr.msk.bf16.vlgmr.msra.gmra.mxu0 %vm230_vm1, %v719_v47 }
 0x1a9   : > { %v421_v49 = vpop.f32.mrf.mxu0  ;;  %v471_v50 = vpop.f32.mrf.mxu1 }
 0x1aa   : > { %v472_v51 = vadd.f32 %v471_v50, %v421_v49 }
 0x1ab   : > { %v423_v52 = vpop.f32.mrf.mxu0  ;;  %v473_v53 = vpop.f32.mrf.mxu1 }
 0x1ac   : > { %v474_v54 = vadd.f32 %v473_v53, %v423_v52 }
 0x1ad   : > { %v425_v55 = vpop.f32.mrf.mxu0  ;;  %v475_v56 = vpop.f32.mrf.mxu1 }
 0x1af   : > { %v426_v57 = vpop.f32.mrf.mxu0  ;;  %v476_v58 = vpop.f32.mrf.mxu1 }
 0x1b5   : > { %v554_v59 = vpop.f32.mrf.mxu0 }
 0x1b6   : > { %v561_v60 = vmax.f32 %v554_v59, 0.0 }
 0x1b7   : > { %v556_v61 = vpop.f32.mrf.mxu0 }
 0x1b8   : > { %v565_v62 = vpack.c.bf16 %v561_v60, %v561_v60  ;;  %v562_v63 = vmax.f32 %v556_v61, 0.0 }
 0x1b9   : > { %v558_v0 = vpop.f32.mrf.mxu0 }
 0x1ba   : > { %v566_v1 = vpack.c.bf16 %v562_v63, %v562_v63  ;;  %v571_v3 = vsel %vm380_vm2, %v565_v62, 0 }
 0x1bb   : > { %v559_v2 = vpop.f32.mrf.mxu0 }
 0x1bc   : > { %734 = vmatprep.subr.msk.bf16.mxu1 %vm380_vm2, %v566_v1 }
 0x1bd   : > { %591 = vmatpush1.bf16.msra.mxu1 %v571_v3 }
 0x1c0   : > { %735 = vmatmul.mubr.msk.bf16.vlgmr.msra.gmra.mxu1 %vm376_vm3, %v733_v4 }
 0x280   : > { %v610_v5 = vpop.f32.mrf.mxu1 }
 0x281   : > { %v617_v7 = vadd.f32 %v610_v5, %v472_v51 }
 0x282   : > { %v612_v8 = vpop.f32.mrf.mxu1 }
 0x283   : > { %v625_v9 = vadd.f32 %v623_v6, %v617_v7  ;;  %v618_v10 = vadd.f32 %v612_v8, %v474_v54 }
 0x284   : > { %v614_v11 = vpop.f32.mrf.mxu1 }
 0x285   : > { %627 = vst [vmem:[%s197_s12] sm:$0xff] %v625_v9  ;;  %v626_v12 = vadd.f32 %v623_v6, %v618_v10 }
 0x286   : > { %v615_v13 = vpop.f32.mrf.mxu1 }
 0x287   : > { %628 = vst [vmem:[%s197_s12 + $0x8] sm:$0xff] %v626_v12 }
 0x288 PF: > { %s14_s15 = sadd.s32 1, %s780_s15  }
 0x289   : > { %p11_p4 = scmp.ge.s32.totalorder %s14_s15, 4  }
 0x28b   :  { %13 = sbr.rel (!%p11_p4) target bundleno = 1 (0x1), region = 72 }

</bundles_post_ra>
